<compile_context>
chip_gen: v7x
topology: tpu7x:2x2x1
jax: 0.10.0
libtpu: 0.0.40
codegen_flags: <defaults>
</compile_context>

<pallas_src>
import jax
import jax.numpy as jnp
from jax import lax
from jax.experimental import pallas as pl
from jax.experimental.pallas import tpu as pltpu

# ---- small synthetic configuration ------------------------------------------
N = 2            # batch
WAY = 2          # classes per episode
SHOT = 2         # support images per class
DEPTH = 16       # channel dim (c)
NUM_CLASSES = 8  # classifier rows
H = W = 16
EPS = 1e-3


# --------------------------- fused kernel ------------------------------------
def _make_fused_kernel(way, shot, c, hw, num_classes, eps):
    ws = way * shot
    inv_hw = 1.0 / float(hw)
    inv_shot = 1.0 / float(shot)

    def kernel(labels_ref, fs_ref, ys_ref, params_ref, basew_ref, emb_ref, o_ref):
        i = pl.program_id(0)

        fs = fs_ref[0]                              # (ws, c, hw)
        msk = ys_ref[0]                             # (ws, 1, hw)

        # Batched masked spatial sum for all way*shot support samples at once:
        # VPU multiply + one reduction over hw.
        s = jnp.sum(fs * msk, axis=-1)              # (ws, c)
        msum = jnp.sum(msk, axis=-1)                # (ws, 1)

        # Packed GAM/MAP parameters: [wg1, wg2, wmap, biases(bg1,bg2,bmap rows)]
        wg1 = params_ref[0]                         # (c, c)
        wg2 = params_ref[1]                         # (c, c)
        wmap = params_ref[2]                        # (c, c)
        biases = params_ref[3]                      # (c, c); rows 0..2 used
        bg1 = biases[0:1, :]                        # (1, c)
        bg2 = biases[1:2, :]
        bmap = biases[2:3, :]

        # GAM gate: global-avg-pool(mask*Fs) -> 1x1 conv -> ReLU -> 1x1 conv
        #           -> (dropout = identity) -> sigmoid        -- batched over ws
        att = s * inv_hw                            # (ws, c)
        hid = jnp.maximum(
            jnp.dot(att, wg1, preferred_element_type=jnp.float32) + bg1, 0.0)
        gate = jax.nn.sigmoid(
            jnp.dot(hid, wg2, preferred_element_type=jnp.float32) + bg2)

        # MaskedAveragePooling of (gate * Fs) + 1x1 projection
        proto_pre = (gate * s) * pl.reciprocal(msum + eps, approx=True)
        proto = jnp.dot(proto_pre, wmap,
                        preferred_element_type=jnp.float32) + bmap   # (ws, c)

        # Classifier weight assembly: replace rows[labels] with the per-way
        # shot-mean prototypes (last-write-wins, like the PyTorch loop).
        wn = basew_ref[...]                         # (num_classes, c)
        row_ids = lax.broadcasted_iota(jnp.int32, wn.shape, 0)
        for wd in range(way):                       # static unroll, way is tiny
            p_row = jnp.sum(proto[wd * shot:(wd + 1) * shot, :],
                            axis=0, keepdims=True) * inv_shot       # (1, c)
            lbl = labels_ref[i, wd]                 # scalar from SMEM
            wn = jnp.where(row_ids == lbl, p_row, wn)

        # logits = weight @ embedding -> (num_classes, hw); lane-dense store
        o_ref[0] = jnp.dot(wn, emb_ref[0],
                           preferred_element_type=jnp.float32
                           ).astype(o_ref.dtype)

    return kernel


# ------------------------------- wrapper --------------------------------------
def weight_estimator_forward(embedding, Fs, Ys, labels, params, eps=EPS):
    wg1, bg1, wg2, bg2, wmap, bmap, base_w = params
    n, way, shot, c, h, w = Fs.shape
    num_classes = base_w.shape[0]
    hw = h * w
    ws = way * shot

    # Free, contiguous reshapes only (no transposes, no padding round-trip).
    fs_flat = Fs.reshape(n, ws, c, hw)
    ys_flat = Ys.reshape(n, ws, 1, hw).astype(jnp.float32)
    emb_flat = embedding.reshape(n, c, hw)
    labels_i32 = labels.astype(jnp.int32)

    # Pack the six tiny GAM/MAP parameters into one constant operand.
    params_packed = jnp.zeros((4, c, c), jnp.float32)
    params_packed = params_packed.at[0].set(wg1).at[1].set(wg2).at[2].set(wmap)
    params_packed = params_packed.at[3, 0].set(bg1[0])
    params_packed = params_packed.at[3, 1].set(bg2[0])
    params_packed = params_packed.at[3, 2].set(bmap[0])

    flops = n * (2 * ws * c * hw            # masked mul + spatial reduce
                 + 3 * 2 * ws * c * c       # GAM/MAP 1x1 convs
                 + 2 * num_classes * c * hw)  # logits matmul
    cost = pl.CostEstimate(
        flops=int(flops),
        transcendentals=int(n * ws * (c + 1)),   # sigmoid + approx reciprocal
        bytes_accessed=int(4 * (fs_flat.size + ys_flat.size + emb_flat.size
                                + params_packed.size + base_w.size
                                + labels_i32.size + n * num_classes * hw)))

    logits = pl.pallas_call(
        _make_fused_kernel(way, shot, c, hw, num_classes, eps),
        out_shape=jax.ShapeDtypeStruct((n, num_classes, hw), jnp.float32),
        grid_spec=pltpu.PrefetchScalarGridSpec(
            num_scalar_prefetch=1,
            grid=(n,),
            in_specs=[
                pl.BlockSpec((1, ws, c, hw), lambda i, lbl: (i, 0, 0, 0)),
                pl.BlockSpec((1, ws, 1, hw), lambda i, lbl: (i, 0, 0, 0)),
                pl.BlockSpec((4, c, c), lambda i, lbl: (0, 0, 0)),
                pl.BlockSpec((num_classes, c), lambda i, lbl: (0, 0)),
                pl.BlockSpec((1, c, hw), lambda i, lbl: (i, 0, 0)),
            ],
            out_specs=pl.BlockSpec((1, num_classes, hw),
                                   lambda i, lbl: (i, 0, 0)),
        ),
        compiler_params=pltpu.CompilerParams(
            dimension_semantics=("parallel",)),
        cost_estimate=cost,
    )(labels_i32, fs_flat, ys_flat, params_packed, base_w, emb_flat)

    return logits.reshape(n, num_classes, h, w)


# ------------------------ pure-JAX reference ----------------------------------
def weight_estimator_reference(embedding, Fs, Ys, labels, params, eps=EPS):
    wg1, bg1, wg2, bg2, wmap, bmap, base_w = params
    n, way, shot, c, h, w = Fs.shape
    hw = h * w
    b = n * way * shot

    fs = Fs.reshape(b, c, hw)
    ys = Ys.reshape(b, hw).astype(jnp.float32)

    s = jnp.einsum("bp,bcp->bc", ys, fs)                  # masked spatial sum
    msum = jnp.sum(ys, axis=1, keepdims=True)             # (b, 1)
    att = s / hw                                          # GAM avg-pool
    hid = jax.nn.relu(att @ wg1 + bg1)
    gate = jax.nn.sigmoid(hid @ wg2 + bg2)
    proto_pre = (gate * s) / (msum + eps)                 # MAP
    proto = proto_pre @ wmap + bmap                       # 1x1 projection
    proto = proto.reshape(n, way, shot, c).mean(axis=2)   # (n, way, c)

    wlist = []
    for bi in range(n):
        wn = base_w
        for wd in range(way):
            wn = wn.at[labels[bi, wd]].set(proto[bi, wd])
        wlist.append(wn)
    weights = jnp.stack(wlist, axis=0)                    # (n, num_classes, c)

    emb = embedding.reshape(n, c, hw)
    logits = jnp.einsum("nkc,ncp->nkp", weights, emb)
    return logits.reshape(n, -1, h, w)


def init_params(key, depth, num_classes):
    ks = jax.random.split(key, 7)
    nrm = lambda k, shp, s: jax.random.normal(k, shp, jnp.float32) * s
    wg1 = nrm(ks[0], (depth, depth), 0.1); bg1 = nrm(ks[1], (1, depth), 0.1)
    wg2 = nrm(ks[2], (depth, depth), 0.1); bg2 = nrm(ks[3], (1, depth), 0.1)
    wmap = nrm(ks[4], (depth, depth), 0.2); bmap = nrm(ks[5], (1, depth), 0.1)
    base_w = nrm(ks[6], (num_classes, depth), 0.05)
    return (wg1, bg1, wg2, bg2, wmap, bmap, base_w)


if __name__ == "__main__":
    key = jax.random.PRNGKey(0)
    k_emb, k_fs, k_ys, k_p = jax.random.split(key, 4)

    embedding = jax.random.normal(k_emb, (N, DEPTH, H, W), jnp.float32)
    Fs = jax.random.normal(k_fs, (N, WAY, SHOT, DEPTH, H, W), jnp.float32)
    Ys = (jax.random.uniform(k_ys, (N, WAY, SHOT, H, W)) > 0.4).astype(jnp.float32)
    labels = jnp.array([[1, 4], [0, 6]], dtype=jnp.int32)
    params = init_params(k_p, DEPTH, NUM_CLASSES)

    out = weight_estimator_forward(embedding, Fs, Ys, labels, params)
    out = jax.block_until_ready(out)
    assert out.shape == (N, NUM_CLASSES, H, W)

    ref = weight_estimator_reference(embedding, Fs, Ys, labels, params)
    scale = float(jnp.max(jnp.abs(ref)))
    err = float(jnp.max(jnp.abs(out - ref)))
    # default (non-HIGHEST) MXU precision + approx EUP reciprocal in the kernel
    tol = 1e-2 * max(1.0, scale)
    if not err < tol:
        raise AssertionError(f"Pallas/ref mismatch: max abs err={err}, tol={tol}")

    print("KERNEL_OK")
</pallas_src>

<mosaic_0001>
module attributes {stable_mosaic.version = 11 : i64} {
  func.func @kernel(%arg0: i32, %arg1: memref<2x2xi32, #tpu.memory_space<smem>>, %arg2: memref<1x4x16x256xf32, #tpu.memory_space<vmem>>, %arg3: memref<1x4x1x256xf32, #tpu.memory_space<vmem>>, %arg4: memref<4x16x16xf32, #tpu.memory_space<vmem>>, %arg5: memref<8x16xf32, #tpu.memory_space<vmem>>, %arg6: memref<1x16x256xf32, #tpu.memory_space<vmem>>, %arg7: memref<1x8x256xf32, #tpu.memory_space<vmem>>) attributes {dimension_semantics = [#tpu.dimension_semantics<parallel>], iteration_bounds = array<i64: 2>, scalar_prefetch = 1 : i64, scratch_operands = 0 : i64, tpu.core_type = #tpu.core_type<tc>, window_params = [{transform_indices = @transform_0, window_bounds = array<i64: 1, 4, 16, 256>}, {transform_indices = @transform_1, window_bounds = array<i64: 1, 4, 1, 256>}, {pipeline_mode = #tpu.pipeline_mode<synchronous>, transform_indices = @transform_2, window_bounds = array<i64: 4, 16, 16>}, {pipeline_mode = #tpu.pipeline_mode<synchronous>, transform_indices = @transform_3, window_bounds = array<i64: 8, 16>}, {transform_indices = @transform_4, window_bounds = array<i64: 1, 16, 256>}, {transform_indices = @transform_5, window_bounds = array<i64: 1, 8, 256>}]} {
    %c0 = arith.constant 0 : index
    %c0_0 = arith.constant 0 : index
    %c0_1 = arith.constant 0 : index
    %c0_2 = arith.constant 0 : index
    %0 = vector.load %arg2[%c0, %c0_0, %c0_1, %c0_2] : memref<1x4x16x256xf32, #tpu.memory_space<vmem>>, vector<1x4x16x256xf32>
    %1 = vector.shape_cast %0 : vector<1x4x16x256xf32> to vector<4x16x256xf32>
    %c0_3 = arith.constant 0 : index
    %c0_4 = arith.constant 0 : index
    %c0_5 = arith.constant 0 : index
    %c0_6 = arith.constant 0 : index
    %2 = vector.load %arg3[%c0_3, %c0_4, %c0_5, %c0_6] : memref<1x4x1x256xf32, #tpu.memory_space<vmem>>, vector<1x4x1x256xf32>
    %3 = vector.shape_cast %2 : vector<1x4x1x256xf32> to vector<4x1x256xf32>
    %4 = vector.broadcast %3 : vector<4x1x256xf32> to vector<4x16x256xf32>
    %5 = arith.mulf %1, %4 : vector<4x16x256xf32>
    %cst = arith.constant dense<0.000000e+00> : vector<4x16xf32>
    %6 = vector.multi_reduction <add>, %5, %cst [2] : vector<4x16x256xf32> to vector<4x16xf32>
    %cst_7 = arith.constant dense<0.000000e+00> : vector<4x1xf32>
    %7 = vector.multi_reduction <add>, %3, %cst_7 [2] : vector<4x1x256xf32> to vector<4x1xf32>
    %c0_8 = arith.constant 0 : index
    %c0_9 = arith.constant 0 : index
    %c0_10 = arith.constant 0 : index
    %8 = vector.load %arg4[%c0_8, %c0_9, %c0_10] : memref<4x16x16xf32, #tpu.memory_space<vmem>>, vector<1x16x16xf32>
    %9 = vector.shape_cast %8 : vector<1x16x16xf32> to vector<16x16xf32>
    %c1 = arith.constant 1 : index
    %c0_11 = arith.constant 0 : index
    %c0_12 = arith.constant 0 : index
    %10 = vector.load %arg4[%c1, %c0_11, %c0_12] : memref<4x16x16xf32, #tpu.memory_space<vmem>>, vector<1x16x16xf32>
    %11 = vector.shape_cast %10 : vector<1x16x16xf32> to vector<16x16xf32>
    %c2 = arith.constant 2 : index
    %c0_13 = arith.constant 0 : index
    %c0_14 = arith.constant 0 : index
    %12 = vector.load %arg4[%c2, %c0_13, %c0_14] : memref<4x16x16xf32, #tpu.memory_space<vmem>>, vector<1x16x16xf32>
    %13 = vector.shape_cast %12 : vector<1x16x16xf32> to vector<16x16xf32>
    %c3 = arith.constant 3 : index
    %c0_15 = arith.constant 0 : index
    %c0_16 = arith.constant 0 : index
    %14 = vector.load %arg4[%c3, %c0_15, %c0_16] : memref<4x16x16xf32, #tpu.memory_space<vmem>>, vector<1x16x16xf32>
    %15 = vector.shape_cast %14 : vector<1x16x16xf32> to vector<16x16xf32>
    %16 = vector.extract_strided_slice %15 {offsets = [0, 0], sizes = [1, 16], strides = [1, 1]} : vector<16x16xf32> to vector<1x16xf32>
    %17 = vector.extract_strided_slice %15 {offsets = [1, 0], sizes = [1, 16], strides = [1, 1]} : vector<16x16xf32> to vector<1x16xf32>
    %18 = vector.extract_strided_slice %15 {offsets = [2, 0], sizes = [1, 16], strides = [1, 1]} : vector<16x16xf32> to vector<1x16xf32>
    %cst_17 = arith.constant 3.906250e-03 : f32
    %19 = vector.broadcast %cst_17 : f32 to vector<4x16xf32>
    %20 = arith.mulf %6, %19 : vector<4x16xf32>
    %cst_18 = arith.constant dense<0.000000e+00> : vector<4x16xf32>
    %21 = tpu.matmul %20, %9, %cst_18 {dimension_numbers = #tpu.dot_dimension_numbers<[1], [0], [0], [1], [0, 0, 1, 1], [], []>} : vector<4x16xf32>, vector<16x16xf32>, vector<4x16xf32> -> vector<4x16xf32>
    %22 = vector.broadcast %16 : vector<1x16xf32> to vector<4x16xf32>
    %23 = arith.addf %21, %22 : vector<4x16xf32>
    %cst_19 = arith.constant 0.000000e+00 : f32
    %24 = vector.broadcast %cst_19 : f32 to vector<4x16xf32>
    %25 = arith.maximumf %23, %24 : vector<4x16xf32>
    %cst_20 = arith.constant dense<0.000000e+00> : vector<4x16xf32>
    %26 = tpu.matmul %25, %11, %cst_20 {dimension_numbers = #tpu.dot_dimension_numbers<[1], [0], [0], [1], [0, 0, 1, 1], [], []>} : vector<4x16xf32>, vector<16x16xf32>, vector<4x16xf32> -> vector<4x16xf32>
    %27 = vector.broadcast %17 : vector<1x16xf32> to vector<4x16xf32>
    %28 = arith.addf %26, %27 : vector<4x16xf32>
    %29 = arith.negf %28 : vector<4x16xf32>
    %30 = math.exp %29 : vector<4x16xf32>
    %cst_21 = arith.constant 1.000000e+00 : f32
    %31 = vector.broadcast %cst_21 : f32 to vector<4x16xf32>
    %32 = arith.addf %31, %30 : vector<4x16xf32>
    %33 = arith.divf %31, %32 : vector<4x16xf32>
    %34 = arith.mulf %33, %6 : vector<4x16xf32>
    %cst_22 = arith.constant 1.000000e-03 : f32
    %35 = vector.broadcast %cst_22 : f32 to vector<4x1xf32>
    %36 = arith.addf %7, %35 : vector<4x1xf32>
    %37 = tpu.reciprocal %36 {approx = true} : vector<4x1xf32> -> vector<4x1xf32>
    %38 = vector.broadcast %37 : vector<4x1xf32> to vector<4x16xf32>
    %39 = arith.mulf %34, %38 : vector<4x16xf32>
    %cst_23 = arith.constant dense<0.000000e+00> : vector<4x16xf32>
    %40 = tpu.matmul %39, %13, %cst_23 {dimension_numbers = #tpu.dot_dimension_numbers<[1], [0], [0], [1], [0, 0, 1, 1], [], []>} : vector<4x16xf32>, vector<16x16xf32>, vector<4x16xf32> -> vector<4x16xf32>
    %41 = vector.broadcast %18 : vector<1x16xf32> to vector<4x16xf32>
    %42 = arith.addf %40, %41 : vector<4x16xf32>
    %c0_24 = arith.constant 0 : index
    %c0_25 = arith.constant 0 : index
    %43 = vector.load %arg5[%c0_24, %c0_25] : memref<8x16xf32, #tpu.memory_space<vmem>>, vector<8x16xf32>
    %44 = tpu.iota {dimensions = array<i32: 0>} : vector<8x16xi32>
    %45 = vector.extract_strided_slice %42 {offsets = [0, 0], sizes = [2, 16], strides = [1, 1]} : vector<4x16xf32> to vector<2x16xf32>
    %cst_26 = arith.constant dense<0.000000e+00> : vector<16xf32>
    %46 = vector.multi_reduction <add>, %45, %cst_26 [0] : vector<2x16xf32> to vector<16xf32>
    %47 = vector.shape_cast %46 : vector<16xf32> to vector<1x16xf32>
    %cst_27 = arith.constant 5.000000e-01 : f32
    %48 = vector.broadcast %cst_27 : f32 to vector<1x16xf32>
    %49 = arith.mulf %47, %48 : vector<1x16xf32>
    %50 = arith.index_cast %arg0 : i32 to index
    %c0_28 = arith.constant 0 : index
    %51 = memref.load %arg1[%50, %c0_28] : memref<2x2xi32, #tpu.memory_space<smem>>
    %52 = vector.broadcast %51 : i32 to vector<8x16xi32>
    %53 = arith.cmpi eq, %44, %52 : vector<8x16xi32>
    %54 = vector.shape_cast %49 : vector<1x16xf32> to vector<1x16xf32>
    %55 = vector.broadcast %54 : vector<1x16xf32> to vector<8x16xf32>
    %56 = arith.select %53, %55, %43 : vector<8x16xi1>, vector<8x16xf32>
    %57 = vector.extract_strided_slice %42 {offsets = [2, 0], sizes = [2, 16], strides = [1, 1]} : vector<4x16xf32> to vector<2x16xf32>
    %cst_29 = arith.constant dense<0.000000e+00> : vector<16xf32>
    %58 = vector.multi_reduction <add>, %57, %cst_29 [0] : vector<2x16xf32> to vector<16xf32>
    %59 = vector.shape_cast %58 : vector<16xf32> to vector<1x16xf32>
    %cst_30 = arith.constant 5.000000e-01 : f32
    %60 = vector.broadcast %cst_30 : f32 to vector<1x16xf32>
    %61 = arith.mulf %59, %60 : vector<1x16xf32>
    %62 = arith.index_cast %arg0 : i32 to index
    %c1_31 = arith.constant 1 : index
    %63 = memref.load %arg1[%62, %c1_31] : memref<2x2xi32, #tpu.memory_space<smem>>
    %64 = vector.broadcast %63 : i32 to vector<8x16xi32>
    %65 = arith.cmpi eq, %44, %64 : vector<8x16xi32>
    %66 = vector.shape_cast %61 : vector<1x16xf32> to vector<1x16xf32>
    %67 = vector.broadcast %66 : vector<1x16xf32> to vector<8x16xf32>
    %68 = arith.select %65, %67, %56 : vector<8x16xi1>, vector<8x16xf32>
    %c0_32 = arith.constant 0 : index
    %c0_33 = arith.constant 0 : index
    %c0_34 = arith.constant 0 : index
    %69 = vector.load %arg6[%c0_32, %c0_33, %c0_34] : memref<1x16x256xf32, #tpu.memory_space<vmem>>, vector<1x16x256xf32>
    %70 = vector.shape_cast %69 : vector<1x16x256xf32> to vector<16x256xf32>
    %cst_35 = arith.constant dense<0.000000e+00> : vector<8x256xf32>
    %71 = tpu.matmul %68, %70, %cst_35 {dimension_numbers = #tpu.dot_dimension_numbers<[1], [0], [0], [1], [0, 0, 1, 1], [], []>} : vector<8x16xf32>, vector<16x256xf32>, vector<8x256xf32> -> vector<8x256xf32>
    %c0_36 = arith.constant 0 : index
    %c0_37 = arith.constant 0 : index
    %c0_38 = arith.constant 0 : index
    %72 = vector.load %arg7[%c0_36, %c0_37, %c0_38] : memref<1x8x256xf32, #tpu.memory_space<vmem>>, vector<1x8x256xf32>
    %73 = vector.shape_cast %72 : vector<1x8x256xf32> to vector<8x256xf32>
    %74 = vector.shape_cast %71 : vector<8x256xf32> to vector<1x8x256xf32>
    tpu.vector_store %arg7[%c0_36, %c0_37, %c0_38], %74 {strides = array<i32>} : memref<1x8x256xf32, #tpu.memory_space<vmem>>, vector<1x8x256xf32>,
    return
  }
  func.func @transform_0(%arg0: i32, %arg1: memref<2x2xi32, #tpu.memory_space<smem>>) -> (i32, i32, i32, i32) {
    %c0_i32 = arith.constant 0 : i32
    %c0_i32_0 = arith.constant 0 : i32
    %c0_i32_1 = arith.constant 0 : i32
    %c0_i32_2 = arith.constant 0 : i32
    return %arg0, %c0_i32, %c0_i32_0, %c0_i32_1 : i32, i32, i32, i32
  }
  func.func @transform_1(%arg0: i32, %arg1: memref<2x2xi32, #tpu.memory_space<smem>>) -> (i32, i32, i32, i32) {
    %c0_i32 = arith.constant 0 : i32
    %c0_i32_0 = arith.constant 0 : i32
    %c0_i32_1 = arith.constant 0 : i32
    %c0_i32_2 = arith.constant 0 : i32
    return %arg0, %c0_i32, %c0_i32_0, %c0_i32_1 : i32, i32, i32, i32
  }
  func.func @transform_2(%arg0: i32, %arg1: memref<2x2xi32, #tpu.memory_space<smem>>) -> (i32, i32, i32) {
    %c0_i32 = arith.constant 0 : i32
    %c0_i32_0 = arith.constant 0 : i32
    %c0_i32_1 = arith.constant 0 : i32
    %c0_i32_2 = arith.constant 0 : i32
    return %c0_i32, %c0_i32_0, %c0_i32_1 : i32, i32, i32
  }
  func.func @transform_3(%arg0: i32, %arg1: memref<2x2xi32, #tpu.memory_space<smem>>) -> (i32, i32) {
    %c0_i32 = arith.constant 0 : i32
    %c0_i32_0 = arith.constant 0 : i32
    %c0_i32_1 = arith.constant 0 : i32
    return %c0_i32, %c0_i32_0 : i32, i32
  }
  func.func @transform_4(%arg0: i32, %arg1: memref<2x2xi32, #tpu.memory_space<smem>>) -> (i32, i32, i32) {
    %c0_i32 = arith.constant 0 : i32
    %c0_i32_0 = arith.constant 0 : i32
    %c0_i32_1 = arith.constant 0 : i32
    return %arg0, %c0_i32, %c0_i32_0 : i32, i32, i32
  }
  func.func @transform_5(%arg0: i32, %arg1: memref<2x2xi32, #tpu.memory_space<smem>>) -> (i32, i32, i32) {
    %c0_i32 = arith.constant 0 : i32
    %c0_i32_0 = arith.constant 0 : i32
    %c0_i32_1 = arith.constant 0 : i32
    return %arg0, %c0_i32, %c0_i32_0 : i32, i32, i32
  }
}

</mosaic_0001>

<bundles_post_ra>
// kernel: tpu_custom_call.1
= control target key start
LH: loop header
LB: loop body
LE: loop exit
PB: predicated region body
PF: predicated region fallthrough
CT: control target
= control target key end

     0   :  { %s1973_s0 = inlined_call_operand.hbm [shape: s32[2,2], index: 0, kind: input, shape index: {}]   ;;  %s1974_s1 = inlined_call_operand.hbm [shape: f32[2,4,16,256], index: 1, kind: input, shape index: {}]   ;;  %s1975_s2 = inlined_call_operand.hbm [shape: f32[2,4,1,256], index: 2, kind: input, shape index: {}]   ;;  %s1976_s3 = inlined_call_operand.hbm [shape: f32[4,16,16], index: 3, kind: input, shape index: {}]   ;;  %s1977_s4 = inlined_call_operand.vmem [shape: f32[8,16], index: 4, kind: input, shape index: {}]   ;;  %s1978_s5 = inlined_call_operand.hbm [shape: f32[2,16,256], index: 5, kind: input, shape index: {}]   ;;  %s1979_s6 = inlined_call_operand.hbm [shape: f32[2,8,256], index: 6, kind: output, shape index: {}]  }
   0x1   :  { %1986 = sst [smem:[#allocation21_spill]] %s1974_s1  ;;  %s1278_s23 = scalar_lea.hbm %s1973_s0, 32 }
   0x2   :  { %1987 = sst [smem:[#allocation22_spill]] %s1976_s3  ;;  %p1279_p0 = scmp.ne.s32.totalorder %s1973_s0, %s1278_s23 }
   0x3   :  { %p1282_p1 = scmp.lt.u32.totalorder %s1278_s23, %s1973_s0 }
   0x5   :  { %p1284_p2 = pnand %p1282_p1, %p1279_p0 }
   0x7   :  { %1287 = shalt.err (!%p1284_p2)  }
   0x8   :  { %s1488_s28 = smov [#allocation3]  }
   0x9   :  { %12 = dma.hbm_to_smem %s1973_s0, 32, %s1488_s28, [#allocation2] }
   0xa   :  { %1450 = dma.done.wait [#allocation2], 32 }
   0xb   :  { %1451 = vsyncadd [#allocation2], 4294967264 }
   0xc   :  { %14 = sfence }
   0xd   :  { %15 = vsyncpa [#allocation5], 0 }
   0xe   :  { %17 = vsyncpa [#allocation5 + $0x1], 0 }
   0xf   :  { %18 = vsyncpa [#allocation8], 0 }
  0x10   :  { %20 = vsyncpa [#allocation8 + $0x1], 0 }
  0x11   :  { %21 = vsyncpa [#allocation11], 0 }
  0x12   :  { %23 = vsyncpa [#allocation11 + $0x1], 0 }
  0x13   :  { %24 = vsyncpa [#allocation6], 0 }
  0x14   :  { %26 = vsyncpa [#allocation6 + $0x1], 0  ;;  %s1550_s7 = smov 0   ;;  %s1552_s8 = smov 0  }
  0x15   :  { %s1554_s9 = smov 0   ;;  %s1556_s10 = smov 0  }
  0x16 LB: > { %1988 = sst [smem:[#allocation19_spill]] %s1482_s9  ;;  %s1571_s0 = sadd.s32 4294967295, %s1486_s10   ;;  %s1486_s10 = sphi %s1556_s10, %s2014_s10   ;;  %s1482_s9 = sphi %s1554_s9, %s2011_s9   ;;  %s1478_s8 = sphi %s1552_s8, %s2013_s8   ;;  %s1474_s7 = sphi %s1550_s7, %s2012_s7  }
  0x17   : > { %s1112_s11 = sadd.s32 4294967294, %s1486_s10   ;;  %s1575_s12 = sadd.s32 1, %s1486_s10  }
  0x18   : > { %s39_s13 = sadd.s32 1, %s1482_s9  ;;  %s36_s14 = ssub.s32 %s1486_s10, %s1575_s12 }
  0x19   : > { %p46_p3 = scmp.ne.s32.totalorder %s1482_s9, %s1478_s8  ;;  %p37_p4 = scmp.eq.s32.totalorder %s36_s14, 0 }
  0x1a   : > { %p47_p5 = scmp.eq.s32.totalorder %s1486_s10, 0  ;;  %p52_p6 = scmp.ne.s32.totalorder %s1478_s8, %s1474_s7 }
  0x1b   : > { %p1980_p7 = scmp.eq.s32.totalorder %s1571_s0, 0  ;;  %p170_p10 = scmp.eq.s32.totalorder %s1571_s0, 1 }
  0x1c   : > { %s1587_s15 = scalar_select %p37_p4, %s1482_s9, %s39_s13  }
  0x1d   : > { %p1589_p8 = por %p47_p5, %p46_p3  ;;  %p1595_p9 = por %p1980_p7, %p52_p6 }
  0x1e   : > { %1989 = sst [smem:[#allocation20_spill]] %s1587_s15  ;;  %p176_p11 = scmp.eq.s32.totalorder %s1112_s11, 1 }
  0x1f   : > { %s1990_s16 = scalar_select %p1589_p8, 1, 0 }
  0x20   : > { %s1991_s17 = scalar_select %p1595_p9, 1, 0 }
  0x21   : > { %p1113_p12 = scmp.ge.s32.totalorder %s1486_s10, 1  ;;  %p183_p13 = scmp.lt.s32.totalorder %s1486_s10, 3 }
  0x22   : > { %p1602_p0 = por %p170_p10, %p46_p3  ;;  %p1606_p1 = por %p176_p11, %p52_p6 }
  0x23   : > { %p1610_p2 = pnand %p1113_p12, %p183_p13  ;;  %s1489_s21 = smov [#allocation9]  }
  0x24   : > { %s1992_s18 = scalar_select %p1602_p0, 1, 0 }
  0x25   : > { %s1993_s19 = scalar_select %p1606_p1, 1, 0 }
  0x26   : > { %s1994_s20 = scalar_select %p1610_p2, 1, 0 }
  0x27   : > { %p1201_p4 = pneg %p1610_p2  ;;  %s195_s22 = sshll.u32 %s1489_s21, 4  ;;  %s196_s22 = int_to_ptr.vmem [resolvable:$true] %s195_s22 }
  0x28   : > { %s1625_s24 = sand.u32 1, %s1482_s9   ;;  %s1996_s3 = sld [smem:[#allocation22_spill]] }
  0x29   : > { %p1618_p5 = pnand %p1201_p4, %p1980_p7 }
  0x2b   : > { %p1290_p11 = pneg %p1618_p5 }
  0x2e   : > { %s1288_s27 = scalar_lea.hbm %s1996_s3, 1024 }
  0x2f   : > { %p1289_p10 = scmp.ne.s32.totalorder %s1996_s3, %s1288_s27  ;;  %p1295_p4 = scmp.lt.u32.totalorder %s1288_s27, %s1996_s3 }
  0x31   : > { %p1291_p12 = pnand %p1290_p11, %p1289_p10 }
  0x33   : > { %p1292_p13 = pneg %p1291_p12 }
  0x35   : > { %p1297_p3 = pnand %p1295_p4, %p1292_p13 }
  0x37   : > { %1300 = shalt.err (!%p1297_p3)
}
  0x38   : > { %s1301_s13 = scalar_lea.vmem %s196_s22, 1024  ;;  %p1309_p0 = scmp.lt.s32.totalorder %s196_s22, %s196_s22 }
  0x39   : > { %p1302_p7 = scmp.ne.s32.totalorder %s196_s22, %s1301_s13  ;;  %p1310_p9 = scmp.lt.s32.totalorder %s1301_s13, %s1301_s13 }
  0x3b   : > { %p1304_p6 = pnand %p1302_p7, %p1290_p11  ;;  %p1311_p2 = por %p1310_p9, %p1309_p0 }
  0x3d   : > { %p1305_p1 = pneg %p1304_p6 }
  0x3f   : > { %p1312_p8 = pnand %p1311_p2, %p1305_p1 }
  0x41   : > { %1315 = shalt.err (!%p1312_p8)
}
  0x42   : > { %s1490_s14 = smov 128   ;;  %s1491_s21 = smov 8  }
  0x43   : > { %1204 = dma.hbm_to_vmem [thread:$0]  (!%p1618_p5), %s1996_s3, 1024, %s196_s22, [#allocation8], %s1490_s14, %s1490_s14, %s1491_s21  }
  0x44   : > { %s1116_s27 = sshll.u32 %s1625_s24, 7  ;;  %s1142_s28 = sshll.u32 %s1486_s10, 11 }
  0x45   : > { %s1997_s1 = sld [smem:[#allocation21_spill]]  ;;  %s216_s13 = scalar_lea.vmem [#allocation4], %s1116_s27 }
  0x46   : > { %s223_s15 = sshll.u32 %s216_s13, 4  ;;  %p1998_p7 = scmp.ne.s32.totalorder %s1990_s16, 0  ;;  %s1658_s15 = int_to_ptr.vmem [resolvable:$true] %s223_s15 }
  0x47   : > { %p1999_p8 = scmp.lt.s32.totalorder %s1486_s10, 2  ;;  %s213_s22 = scalar_lea.sflag [#allocation5], %s1625_s24 }
  0x49   : > { %p1654_p9 = pnand %p1999_p8, %p1998_p7 }
  0x4b   : > { %s1648_s11 = scalar_lea.hbm %s1997_s1, %s1142_s28  ;;  %p1665_p1 = pneg %p1654_p9 }
  0x4c   : > { %s1316_s14 = scalar_lea.hbm %s1648_s11, 2048  ;;  %s1321_s26 = scalar_lea.hbm %s1997_s1, 4096 }
  0x4d   : > { %p1317_p0 = scmp.ne.s32.totalorder %s1648_s11, %s1316_s14  ;;  %p1322_p3 = scmp.lt.u32.totalorder %s1648_s11, %s1997_s1 }
  0x4e   : > { %p1323_p6 = scmp.lt.u32.totalorder %s1321_s26, %s1316_s14  ;;  %p1325_p11 = scmp.lt.u32.totalorder %s1316_s14, %s1648_s11 }
  0x4f   : > { %p1319_p2 = pnand %p1665_p1, %p1317_p0 }
  0x50   : > { %p1324_p10 = por %p1323_p6, %p1322_p3 }
  0x51   : > { %p1320_p5 = pneg %p1319_p2 }
  0x52   : > { %p1326_p12 = por %p1325_p11, %p1324_p10 }
  0x54   : > { %p1327_p13 = pnand %p1326_p12, %p1320_p5 }
  0x56   : > { %1330 = shalt.err (!%p1327_p13)
}
  0x57   : > { %s1331_s29 = scalar_lea.vmem %s1658_s15, 2048  ;;  %s1492_s30 = smov [#allocation4]  }
  0x58   : > { %p1332_p4 = scmp.ne.s32.totalorder %s1658_s15, %s1331_s29  ;;  %s1336_s13 = sshll.u32 %s1492_s30, 4  ;;  %s1337_s13 = int_to_ptr.vmem [resolvable:$false] %s1336_s13 }
  0x59   : > { %s1338_s16 = scalar_lea.vmem %s1337_s13, 4096  ;;  %p1339_p0 = scmp.lt.s32.totalorder %s1658_s15, %s1337_s13 }
  0x5a   : > { %p1334_p7 = pnand %p1332_p4, %p1665_p1  ;;  %p1340_p2 = scmp.lt.s32.totalorder %s1338_s16, %s1331_s29 }
  0x5c   : > { %p1335_p8 = pneg %p1334_p7  ;;  %p1341_p3 = por %p1340_p2, %p1339_p0 }
  0x5e   : > { %p1342_p6 = pnand %p1341_p3, %p1335_p8 }
  0x60   : > { %1345 = shalt.err (!%p1342_p6)
}
  0x61   : > { %s1985_s14 = smov 256   ;;  %s1494_s25 = smov 16  }
  0x62   : > { %1208 = dma.hbm_to_vmem [thread:$0]  (!%p1654_p9), %s1648_s11, 2048, %s1658_s15, %s213_s22, %s1985_s14, %s1985_s14, %s1494_s25  }
  0x63   : > { %s233_s26 = sand.u32 1, %s1486_s10   ;;  %s1119_s27 = sshll.u32 %s1625_s24, 3 }
  0x64   : > { %s1143_s28 = sshll.u32 %s1486_s10, 7  ;;  %s237_s29 = scalar_lea.vmem [#allocation7], %s1119_s27 }
  0x65   : > { %s244_s30 = sshll.u32 %s237_s29, 4  ;;  %s1699_s1 = scalar_lea.hbm %s1975_s2, %s1143_s28  ;;  %s1701_s30 = int_to_ptr.vmem [resolvable:$true] %s244_s30 }
  0x66   : > { %s1703_s3 = scalar_lea.sflag [#allocation8], %s233_s26  ;;  %s1346_s9 = scalar_lea.hbm %s1699_s1, 128 }
  0x67   : > { %p1347_p5 = scmp.ne.s32.totalorder %s1699_s1, %s1346_s9  ;;  %s1351_s22 = scalar_lea.hbm %s1975_s2, 256 }
  0x68   : > { %p1352_p12 = scmp.lt.u32.totalorder %s1699_s1, %s1975_s2  ;;  %p1353_p13 = scmp.lt.u32.totalorder %s1351_s22, %s1346_s9 }
  0x69   : > { %p1349_p10 = pnand %p1347_p5, %p1665_p1  ;;  %p1355_p7 = scmp.lt.u32.totalorder %s1346_s9, %s1699_s1 }
  0x6a   : > { %p1354_p4 = por %p1353_p13, %p1352_p12 }
  0x6b   : > { %p1350_p11 = pneg %p1349_p10 }
  0x6c   : > { %p1356_p8 = por %p1355_p7, %p1354_p4 }
  0x6e   : > { %p1357_p0 = pnand %p1356_p8, %p1350_p11 }
  0x70   : > { %1360 = shalt.err (!%p1357_p0)
}
  0x71   : > { %s1361_s26 = scalar_lea.vmem %s1701_s30, 128  ;;  %s1495_s29 = smov [#allocation7]  }
  0x72   : > { %p1362_p2 = scmp.ne.s32.totalorder %s1701_s30, %s1361_s26  ;;  %s1366_s13 = sshll.u32 %s1495_s29, 4  ;;  %s1367_s13 = int_to_ptr.vmem [resolvable:$false] %s1366_s13 }
  0x73   : > { %s1368_s16 = scalar_lea.vmem %s1367_s13, 256  ;;  %p1369_p5 = scmp.lt.s32.totalorder %s1701_s30, %s1367_s13 }
  0x74   : > { %p1364_p3 = pnand %p1362_p2, %p1665_p1  ;;  %p1370_p10 = scmp.lt.s32.totalorder %s1368_s16, %s1361_s26 }
  0x76   : > { %p1365_p6 = pneg %p1364_p3  ;;  %p1371_p12 = por %p1370_p10, %p1369_p5 }
  0x78   : > { %p1372_p13 = pnand %p1371_p12, %p1365_p6 }
  0x7a   : > { %1375 = shalt.err (!%p1372_p13)
}
  0x7b   : > { %s1496_s9 = smov 32   ;;  %s1497_s15 = smov 2  }
  0x7c   : > { %1211 = dma.hbm_to_vmem [thread:$0]  (!%p1654_p9), %s1699_s1, 128, %s1701_s30, %s1703_s3, %s1496_s9, %s1496_s9, %s1497_s15  }
  0x7d   : > { %s1122_s11 = sshll.u32 %s1625_s24, 5  ;;  %s1144_s22 = sshll.u32 %s1486_s10, 9 }
  0x7e   : > { %s1732_s26 = scalar_lea.hbm %s1978_s5, %s1144_s22  ;;  %s258_s29 = scalar_lea.vmem [#allocation10], %s1122_s11 }
  0x7f   : > { %s265_s13 = sshll.u32 %s258_s29, 4  ;;  %s255_s16 = scalar_lea.sflag [#allocation11], %s1625_s24  ;;  %s1734_s13 = int_to_ptr.vmem [resolvable:$true] %s265_s13 }
  0x80   : > { %s1376_s14 = scalar_lea.hbm %s1732_s26, 512  ;;  %s1381_s30 = scalar_lea.hbm %s1978_s5, 1024 }
  0x81   : > { %p1377_p11 = scmp.ne.s32.totalorder %s1732_s26, %s1376_s14  ;;  %p1382_p8 = scmp.lt.u32.totalorder %s1732_s26, %s1978_s5 }
  0x82   : > { %p1383_p0 = scmp.lt.u32.totalorder %s1381_s30, %s1376_s14  ;;  %p1385_p3 = scmp.lt.u32.totalorder %s1376_s14, %s1732_s26 }
  0x83   : > { %p1379_p4 = pnand %p1377_p11, %p1665_p1 }
  0x84   : > { %p1384_p2 = por %p1383_p0, %p1382_p8 }
  0x85   : > { %p1380_p7 = pneg %p1379_p4 }
  0x86   : > { %p1386_p6 = por %p1385_p3, %p1384_p2 }
  0x88   : > { %p1387_p5 = pnand %p1386_p6, %p1380_p7 }
  0x8a   : > { %1390 = shalt.err (!%p1387_p5)
}
  0x8b   : > { %s1391_s11 = scalar_lea.vmem %s1734_s13, 512  ;;  %s1498_s22 = smov [#allocation10]  }
  0x8c   : > { %p1392_p10 = scmp.ne.s32.totalorder %s1734_s13, %s1391_s11  ;;  %s1396_s27 = sshll.u32 %s1498_s22, 4  ;;  %s1397_s27 = int_to_ptr.vmem [resolvable:$false] %s1396_s27 }
  0x8d   : > { %s1398_s28 = scalar_lea.vmem %s1397_s27, 1024  ;;  %p1399_p11 = scmp.lt.s32.totalorder %s1734_s13, %s1397_s27 }
  0x8e   : > { %p1394_p12 = pnand %p1392_p10, %p1665_p1  ;;  %p1400_p4 = scmp.lt.s32.totalorder %s1398_s28, %s1391_s11 }
  0x90   : > { %p1395_p13 = pneg %p1394_p12  ;;  %p1401_p8 = por %p1400_p4, %p1399_p11 }
  0x92   : > { %p1402_p0 = pnand %p1401_p8, %p1395_p13 }
  0x94   : > { %1405 = shalt.err (!%p1402_p0)
}
  0x95   : > { %s2002_s14 = smov 256   ;;  %p2003_p1 = scmp.ne.s32.totalorder %s1994_s20, 0 }
  0x96   : > { %1214 = dma.hbm_to_vmem [thread:$0]  (!%p1654_p9), %s1732_s26, 512, %s1734_s13, %s255_s16, %s2002_s14, %s2002_s14, %s1494_s25  }
  0x97   : > { %277 = sbr.rel (%p2003_p1) target bundleno = 1260 (0x4ec), region = 40  ;;  %s1766_s21 = sand.u32 (!%p2003_p1), 1, %s1478_s8  }
  0x98   : > { %s1126_s29 = sshll.u32 (!%p2003_p1), %s1766_s21, 7  ;;  %s280_s1 = scalar_lea.sflag (!%p2003_p1), [#allocation5], %s1766_s21 }
  0x99   : > { %s1770_s23 = scalar_lea.vmem (!%p2003_p1), [#allocation4], %s1126_s29  ;;  %p2004_p7 = scmp.ne.s32.totalorder (!%p2003_p1), %s1991_s17, 0 }
  0x9e   : > { %1453 = dma.done.wait (%p2004_p7), %s280_s1, 2048  }
  0x9f   : > { %1455 = vsyncadd (%p2004_p7), %s280_s1, 4294965248  ;;  %s288_s20 = sand.u32 1, %s1571_s0   ;;  %s1127_s24 = sshll.u32 %s1766_s21, 3 }
  0xa0   : > { %s289_s25 = scalar_lea.sflag [#allocation8], %s288_s20  ;;  %s1778_s26 = scalar_lea.vmem [#allocation7], %s1127_s24 }
  0xa1   : > { %1457 = dma.done.wait (%p2004_p7), %s289_s25, 128  }
  0xa2   : > { %1459 = vsyncadd (%p2004_p7), %s289_s25, 4294967168  ;;  %p2005_p9 = scmp.eq.s32.totalorder %s1571_s0, 0 }
  0xa4   : > { %1461 = dma.done.wait (%p2005_p9), [#allocation8], 1024   ;;  %p2006_p2 = pmov %p2005_p9 }
  0xa5   : > { %s1129_s13 = sshll.u32 %s1766_s21, 5  ;;  %s302_s16 = scalar_lea.sflag [#allocation11], %s1766_s21 }
  0xa6   : > { %1463 = vsyncadd (%p2006_p2), [#allocation8], 4294966272  ;;  %s1790_s3 = scalar_lea.vmem [#allocation10], %s1129_s13 }
  0xa7   : > { %1465 = dma.done.wait (%p2004_p7), %s302_s16, 512  }
  0xa8   : > { %1467 = vsyncadd (%p2004_p7), %s302_s16, 4294966784  ;;  %v366_v0 = vlaneseq  ;;  %v346_v4 = vld [vmem:[%s1770_s23 + $0x20] sm:$0xff]  ;;  %v347_v5 = vld [vmem:[%s1770_s23 + $0x28] sm:$0xff]  ;;  %v1499_v59 = vmov 0.0|0.0   ;;  %vm1500_vm0 = vmmov 0   ;;  %v1501_v60 = vmov 0.0  }
  0xa9   : > { %v359_v6 = vld [vmem:[%s1778_s26 + $0x2] sm:$0x3]  ;;  %v358_v11 = vld [vmem:[%s1778_s26] sm:$0x3]  ;;  %v348_v14 = vld [vmem:[%s1770_s23 + $0x30] sm:$0xff]  ;;  %1176 = vmatprep.subr.bf16.mxu0 %v1499_v59  ;;  %1179 = vmatprep.subr.bf16.mxu1 %v1499_v59  ;;  %vm508_vm1 = vcmask 130112  }
  0xaa   : > { %v1797_v1 = vshrl.u32 %v366_v0, 7  ;;  %v342_v9 = vld [vmem:[%s1770_s23] sm:$0xff]  ;;  %v343_v10 = vld [vmem:[%s1770_s23 + $0x8] sm:$0xff]  ;;  %v349_v15 = vld [vmem:[%s1770_s23 + $0x38] sm:$0xff]  ;;  %1159 = vmatprep.mubr.msk.f32.mxu0 %vm1500_vm0, %v1501_v60  ;;  %1166 = vmatprep.mubr.msk.f32.mxu1 %vm1500_vm0, %v1501_v60  ;;  %v498_v61 = vand.u32 127, %v366_v0  ;;  %vm537_vm2 = vcmask 1041409  }
  0xab   : > { %v344_v16 = vld [vmem:[%s1770_s23 + $0x10] sm:$0xff]  ;;  %v345_v21 = vld [vmem:[%s1770_s23 + $0x18] sm:$0xff]  ;;  %v360_v28 = vld [vmem:[%s1778_s26 + $0x4] sm:$0x3]  ;;  %vm539_vm3 = vcmask 1042434   ;;  %vm541_vm4 = vcmask 1043459  }
  0xac   : > { %v1800_v2 = vsub.s32 0, %v1797_v1  ;;  %v1803_v3 = vsub.s32 1, %v1797_v1  ;;  %v352_v26 = vld [vmem:[%s1770_s23 + $0x50] sm:$0xff]  ;;  %v353_v27 = vld [vmem:[%s1770_s23 + $0x58] sm:$0xff]  ;;  %v350_v32 = vld [vmem:[%s1770_s23 + $0x40] sm:$0xff]  ;;  %v501_v62 = vsub.s32 %v498_v61, %v1797_v1  ;;  %v503_v63 = vadd.s32 4294967288, %v498_v61 }
  0xad   : > { %v351_v33 = vld [vmem:[%s1770_s23 + $0x48] sm:$0xff]  ;;  %v356_v44 = vld [vmem:[%s1770_s23 + $0x70] sm:$0xff]  ;;  %v357_v45 = vld [vmem:[%s1770_s23 + $0x78] sm:$0xff]  ;;  %vm543_vm5 = vcmask 130048   ;;  %vm446_vm6 = vcmask 1040384   ;;  %vm862_vm7 = vcmask 123904  }
  0xae   : > { %v1809_v7 = vrot.slane %v359_v6, %v1800_v2  ;;  %v1812_v8 = vrot.slane %v359_v6, %v1803_v3  ;;  %v1818_v12 = vrot.slane %v358_v11, %v1800_v2  ;;  %v1821_v13 = vrot.slane %v358_v11, %v1803_v3  ;;  %v361_v34 = vld [vmem:[%s1778_s26 + $0x6] sm:$0x3]  ;;  %v467_v56 = vld [vmem:[#allocation9] sm:$0xff]  ;;  %v468_v57 = vld [vmem:[#allocation9 + $0x8] sm:$0xff]  ;;  %s1135_s17 = sshll.u32 %s1571_s0, 7  ;;  %s1130_s27 = sshll.u32 %s1766_s21, 4 }
  0xaf   : > { %v1839_v30 = vrot.slane %v360_v28, %v1800_v2  ;;  %v1842_v31 = vrot.slane %v360_v28, %v1803_v3  ;;  %v1850_v39 = vrot.slane %v361_v34, %v1800_v2  ;;  %v1853_v40 = vrot.slane %v361_v34, %v1803_v3  ;;  %v354_v46 = vld [vmem:[%s1770_s23 + $0x60] sm:$0xff]  ;;  %v355_v47 = vld [vmem:[%s1770_s23 + $0x68] sm:$0xff]  ;;  %s887_s30 = sadd.s32 1, %s1135_s17  ;;  %s872_s9 = sld [smem:[#allocation3 + %s1135_s17]] }
  0xb0   : > { %v410_v17 = vmul.f32 %v1809_v7, %v346_v4  ;;  %v411_v18 = vmul.f32 %v1812_v8, %v347_v5  ;;  %v412_v19 = vmul.f32 %v1809_v7, %v348_v14  ;;  %v413_v20 = vmul.f32 %v1812_v8, %v349_v15  ;;  %s888_s15 = sld [smem:[#allocation3 + %s887_s30]]  ;;  %s341_s28 = scalar_lea.vmem [#allocation12], %s1130_s27 }
  0xb1   : > { %v406_v22 = vmul.f32 %v1818_v12, %v342_v9  ;;  %v407_v23 = vmul.f32 %v1821_v13, %v343_v10  ;;  %v408_v24 = vmul.f32 %v1818_v12, %v344_v16  ;;  %v409_v25 = vmul.f32 %v1821_v13, %v345_v21  ;;  %s987_s14 = sshll.u32 %s341_s28, 4  ;;  %s1145_s29 = sshll.u32 %s1571_s0, 8  ;;  %s1926_s14 = int_to_ptr.vmem [resolvable:$true] %s987_s14 }
  0xb2   : > { %v428_v29 = vadd.f32 %v411_v18, %v410_v17  ;;  %v431_v36 = vadd.f32 %v413_v20, %v412_v19  ;;  %v416_v37 = vmul.f32 %v1839_v30, %v352_v26  ;;  %v417_v38 = vmul.f32 %v1842_v31, %v353_v27  ;;  %s1931_s20 = scalar_lea.hbm %s1979_s6, %s1145_s29  ;;  %s973_s24 = scalar_lea.sflag [#allocation6], %s1766_s21 }
  0xb3   : > { %v422_v35 = vadd.f32 %v407_v23, %v406_v22  ;;  %v425_v41 = vadd.f32 %v409_v25, %v408_v24  ;;  %v414_v42 = vmul.f32 %v1839_v30, %v350_v32  ;;  %v415_v43 = vmul.f32 %v1842_v31, %v351_v33  ;;  %s1406_s25 = scalar_lea.vmem %s1926_s14, 256  ;;  %p2007_p6 = scmp.ne.s32.totalorder %s1992_s18, 0 }
  0xb4   : > { %429 = vadd.xlane.f32.xlu1 %v428_v29  ;;  %v437_v48 = vadd.f32 %v417_v38, %v416_v37  ;;  %v420_v49 = vmul.f32 %v1850_v39, %v356_v44  ;;  %v421_v50 = vmul.f32 %v1853_v40, %v357_v45  ;;  %v418_v52 = vmul.f32 %v1850_v39, %v354_v46  ;;  %p1407_p3 = scmp.ne.s32.totalorder %s1926_s14, %s1406_s25  ;;  %s1502_s0 = smov [#allocation12]  }
  0xb5   : > { %423 = vadd.xlane.f32.xlu0 %v422_v35  ;;  %v434_v51 = vadd.f32 %v415_v43, %v414_v42  ;;  %v419_v53 = vmul.f32 %v1853_v40, %v355_v47  ;;  %v1177_v58 = vpack.c.bf16 %v468_v57, %v467_v56  ;;  %v506_v9 = vsub.s32 %v503_v63, %v1797_v1  ;;  %s1410_s26 = sshll.u32 %s1502_s0, 4  ;;  %s1411_s26 = int_to_ptr.vmem [resolvable:$false] %s1410_s26 }
  0xb6   : > { %v443_v54 = vadd.f32 %v421_v50, %v420_v49  ;;  %v448_v63 = vsel %vm446_vm6, %v1821_v13, 0.0  ;;  %v476_v13 = vld [vmem:[#allocation9 + $0x30] sm:$0xff]  ;;  %p1408_p5 = pnand %p1407_p3, %p2007_p6  ;;  %s1412_s13 = scalar_lea.vmem %s1411_s26, 512 }
  0xb7   : > { %v440_v55 = vadd.f32 %v419_v53, %v418_v52  ;;  %1178 = vmatpush3.bf16.msra.mxu0 %v1177_v58  ;;  %v470_v58 = vld [vmem:[#allocation9 + $0x10] sm:$0xff]  ;;  %p1413_p12 = scmp.lt.s32.totalorder %s1926_s14, %s1411_s26  ;;  %p1414_p13 = scmp.lt.s32.totalorder %s1412_s13, %s1406_s25 }
  0xb8   : > { %432 = vadd.xlane.f32.xlu1 %v431_v36  ;;  %1182 = vmatprep.subr.bf16.mxu0 %v1499_v59  ;;  %v471_v59 = vld [vmem:[#allocation9 + $0x18] sm:$0xff]  ;;  %p1409_p10 = pneg %p1408_p5 }
  0xb9   : > { %426 = vadd.xlane.f32.xlu0 %v425_v41  ;;  %v1180_v61 = vpack.c.bf16 %v471_v59, %v470_v58  ;;  %p1415_p11 = por %p1414_p13, %p1413_p12 }
  0xbb   : > { %1181 = vmatpush3.bf16.msra.mxu1 %v1180_v61  ;;  %p1416_p4 = pnand %p1415_p11, %p1409_p10 }
  0xbc   : > { %438 = vadd.xlane.f32.xlu1 %v437_v48 }
  0xbd   : > { %435 = vadd.xlane.f32.xlu0 %v434_v51 }
  0xc0   : > { %444 = vadd.xlane.f32.xlu1 %v443_v54 }
  0xc1   : > { %441 = vadd.xlane.f32.xlu0 %v440_v55 }
 0x141   : > { %v430_v4 = vpop.xlane.xlu1 %429 }
 0x142   : > { %v720_v5 = vrot.slane %v430_v4, %v501_v62  ;;  %v424_v6 = vpop.xlane.xlu0 %423  ;;  %v479_v0 = vmul.f32 0.00390625, %v430_v4  ;;  %v452_v4 = vsel %vm446_vm6, %v1809_v7, 0.0  ;;  %v488_v7 = vrot.slane %v476_v13, %v1800_v2 }
 0x143   : > { %v711_v10 = vrot.slane %v424_v6, %v501_v62  ;;  %v477_v20 = vmul.f32 0.00390625, %v424_v6 }
 0x144   : > { %v513_v34 = vrot.slane %v479_v0, %v501_v62 }
 0x145   : > { %v433_v11 = vpop.xlane.xlu1 %432  ;;  %v502_v35 = vrot.slane %v477_v20, %v501_v62 }
 0x146   : > { %v724_v14 = vrot.slane %v433_v11, %v506_v9  ;;  %v427_v15 = vpop.xlane.xlu0 %426  ;;  %v480_v16 = vmul.f32 0.00390625, %v433_v11  ;;  %v458_v11 = vsel %vm446_vm6, %v1842_v31, 0.0  ;;  %v474_v31 = vld [vmem:[#allocation9 + $0x28] sm:$0xff] }
 0x147   : > { %v478_v17 = vmul.f32 0.00390625, %v427_v15  ;;  %v715_v18 = vrot.slane %v427_v15, %v506_v9  ;;  %v463_v15 = vsel %vm446_vm6, %v1853_v40, 0.0  ;;  %v620_v40 = vrot.slane %v476_v13, %v1803_v3 }
 0x148   : > { %v725_v19 = vsel %vm508_vm1, %v724_v14, %v720_v5  ;;  %v517_v27 = vrot.slane %v480_v16, %v506_v9  ;;  %v453_v5 = vsel %vm446_vm6, %v1812_v8, 0.0  ;;  %v462_v14 = vsel %vm446_vm6, %v1850_v39, 0.0 }
 0x149   : > { %v716_v21 = vsel %vm508_vm1, %v715_v18, %v711_v10  ;;  %v439_v22 = vpop.xlane.xlu1 %438  ;;  %v507_v28 = vrot.slane %v478_v17, %v506_v9  ;;  %v457_v10 = vsel %vm446_vm6, %v1839_v30, 0.0  ;;  %v473_v30 = vld [vmem:[#allocation9 + $0x20] sm:$0xff] }
 0x14a   : > { %v744_v23 = vsel %vm537_vm2, %v725_v19, %v716_v21  ;;  %v482_v24 = vmul.f32 0.00390625, %v439_v22  ;;  %v733_v25 = vrot.slane %v439_v22, %v506_v9  ;;  %v436_v26 = vpop.xlane.xlu0 %435  ;;  %v518_v45 = vsel %vm508_vm1, %v517_v27, %v513_v34 }
 0x14b   : > { %v481_v29 = vmul.f32 0.00390625, %v436_v26  ;;  %v729_v32 = vrot.slane %v436_v26, %v501_v62  ;;  %v509_v46 = vsel %vm508_vm1, %v507_v28, %v502_v35  ;;  %v459_v16 = vadd.f32 %v458_v11, %v457_v10 }
 0x14c   : > { %v526_v33 = vrot.slane %v482_v24, %v506_v9  ;;  %v538_v53 = vsel %vm537_vm2, %v518_v45, %v509_v46  ;;  %v1183_v39 = vpack.c.bf16 %v474_v31, %v473_v30 }
 0x14d   : > { %v522_v36 = vrot.slane %v481_v29, %v501_v62  ;;  %v734_v37 = vsel %vm508_vm1, %v733_v25, %v729_v32  ;;  %v445_v38 = vpop.xlane.xlu1 %444 }
 0x14e   : > { %v484_v41 = vmul.f32 0.00390625, %v445_v38  ;;  %v742_v42 = vrot.slane %v445_v38, %v506_v9  ;;  %v442_v43 = vpop.xlane.xlu0 %441  ;;  %v745_v44 = vsel %vm539_vm3, %v734_v37, %v744_v23 }
 0x14f   : > { %v483_v47 = vmul.f32 0.00390625, %v442_v43  ;;  %v738_v48 = vrot.slane %v442_v43, %v501_v62  ;;  %v527_v50 = vsel %vm508_vm1, %v526_v33, %v522_v36 }
 0x150   : > { %v535_v49 = vrot.slane %v484_v41, %v506_v9  ;;  %v540_v56 = vsel %vm539_vm3, %v527_v50, %v538_v53  ;;  %v454_v9 = vadd.f32 %v453_v5, %v452_v4  ;;  %v895_v50 = vld [vmem:[%s1790_s3 + $0x18] sm:$0xff]  ;;  %v894_v53 = vld [vmem:[%s1790_s3 + $0x10] sm:$0xff] }
 0x151   : > { %v531_v51 = vrot.slane %v483_v47, %v501_v62  ;;  %v743_v52 = vsel %vm508_vm1, %v742_v42, %v738_v48  ;;  %v447_v62 = vsel %vm446_vm6, %v1818_v12, 0.0  ;;  %v464_v12 = vadd.f32 %v463_v15, %v462_v14 }
 0x152   : > { %v1883_v54 = vsel %vm541_vm4, %v743_v52, %v745_v44  ;;  %v449_v6 = vadd.f32 %v448_v63, %v447_v62  ;;  %455 = vadd.xlane.f32.xlu1 %v454_v9  ;;  %v892_v52 = vld [vmem:[%s1790_s3] sm:$0xff] }
 0x153   : > { %v536_v55 = vsel %vm508_vm1, %v535_v49, %v531_v51  ;;  %v893_v49 = vld [vmem:[%s1790_s3 + $0x8] sm:$0xff] }
 0x154   : > { %v542_v57 = vsel %vm541_vm4, %v536_v55, %v540_v56  ;;  %450 = vadd.xlane.f32.xlu0 %v449_v6  ;;  %v1185_v51 = vpack.c.bf16 %v895_v50, %v893_v49  ;;  %v1187_v55 = vpack.c.bf16 %v894_v53, %v892_v52 }
 0x155   : > { %1160 = vmatmul.mubr.msk.f32.vlgmr.msra.gmra.mrb[0].mxu0 %vm543_vm5, %v542_v57 }
 0x156   : > { %1173 = vmatprep.mubr.msk.f32.mxu0 %vm1500_vm0, %v1501_v60  ;;  %465 = vadd.xlane.f32.xlu1 %v464_v12 }
 0x157   : > { %1184 = vmatpush3.bf16.msra.mxu0 %v1183_v39  ;;  %1186 = vmatprep.subr.bf16.mxu1 %v1185_v51 }
 0x158   : > { %460 = vadd.xlane.f32.xlu0 %v459_v16  ;;  %v873_v16 = vstv %s872_s9 }
 0x159   : > { %vm874_vm8 = vcmp.eq.s32.totalorder %v1797_v1, %v873_v16 }
 0x1df   : > { %v456_v21 = vpop.xlane.xlu1 %455 }
 0x1e0   : > { %v750_v26 = vadd.f32 0.001, %v456_v21 }
 0x1e1   : > { %v451_v0 = vpop.xlane.xlu0 %450 }
 0x1e2   : > { %v749_v24 = vadd.f32 0.001, %v451_v0 }
 0x1e3   : > { %v466_v29 = vpop.xlane.xlu1 %465 }
 0x1e5   : > { %v461_v27 = vpop.xlane.xlu0 %460 }
 0x1e6   : > { %v751_v28 = vadd.f32 0.001, %v461_v27 }
 0x228   : > { %v612_v8 = vpop.f32.mrb[0].mxu0 }
 0x229   : > { %v613_v17 = vadd.f32 %v612_v8, %v488_v7  ;;  %v1161_v18 = vpop.f32.mrb[1].mxu0  ;;  %v889_v7 = vstv %s888_s15  ;;  %v859_v8 = vld [vmem:[%s1977_s4] sm:$0xff] }
 0x22a   : > { %vm890_vm9 = vcmp.eq.s32.totalorder %v1797_v1, %v889_v7 }
 0x22b   : > { %v616_v19 = vmax.f32 %v613_v17, 0.0 }
 0x22d   : > { %1167 = vmatmul.mubr.msk.f32.vlgmr.msra.gmra.mrb[0].mxu1 %vm543_vm5, %v616_v19 }
 0x22e   : > { %963 = vmatprep.mubr.f32.mxu1 %v1501_v60  ;;  %v752_v60 = vadd.f32 0.001, %v466_v29  ;;  %1188 = vmatpush1.bf16.msra.mxu1 %v1187_v55 }
 0x300   : > { %v690_v20 = vpop.f32.mrb[0].mxu1 }
 0x301   : > { %v691_v22 = vadd.f32 %v690_v20, %v620_v40  ;;  %v1168_v23 = vpop.f32.mrb[1].mxu1 }
 0x303   : > { %v1133_v25 = vmul.f32 -1.442695, %v691_v22 }
 0x305   : > { %1266 = vpow2.f32 %v1133_v25 }
 0x306   : > { %1268 = vrcp.f32 %v749_v24 }
 0x307   : > { %1270 = vrcp.f32 %v750_v26 }
 0x308   : > { %1272 = vrcp.f32 %v751_v28 }
 0x309   : > { %1274 = vrcp.f32 %v752_v60 }
 0x30f   : > { %v1267_v32 = vpop.eup %1266 }
 0x310   : > { %v1269_v33 = vpop.eup %1268  ;;  %v697_v3 = vadd.f32 1.0, %v1267_v32 }
 0x311   : > { %v1271_v34 = vpop.eup %1270  ;;  %v760_v36 = vrot.slane %v1269_v33, %v1800_v2 }
 0x312   : > { %1276 = vrcp.f32 %v697_v3  ;;  %v1273_v35 = vpop.eup %1272  ;;  %v764_v37 = vrot.slane %v1271_v34, %v1800_v2 }
 0x313   : > { %v1275_v38 = vpop.eup %1274  ;;  %v768_v41 = vrot.slane %v1273_v35, %v1800_v2 }
 0x314   : > { %v777_v42 = vsel %vm537_vm2, %v764_v37, %v760_v36  ;;  %v772_v43 = vrot.slane %v1275_v38, %v1800_v2  ;;  %v784_v2 = vsub.s32 2, %v1797_v1 }
 0x315   : > { %v778_v44 = vsel %vm539_vm3, %v768_v41, %v777_v42 }
 0x316   : > { %v779_v47 = vsel %vm541_vm4, %v772_v43, %v778_v44  ;;  %v785_v56 = vrot.slane %v476_v13, %v784_v2 }
 0x31c   : > { %v1277_v45 = vpop.eup %1276 }
 0x31d   : > { %v748_v46 = vmul.f32 %v1277_v45, %v1883_v54 }
 0x31f   : > { %v781_v48 = vmul.f32 %v779_v47, %v748_v46 }
 0x321   : > { %1174 = vmatmul.mubr.msk.f32.vlgmr.msra.gmra.mrb[2].mxu0 %vm543_vm5, %v781_v48 }
 0x3f4   : > { %v855_v57 = vpop.f32.mrb[2].mxu0 }
 0x3f5   : > { %v856_v54 = vadd.f32 %v855_v57, %v785_v56  ;;  %v1175_v58 = vpop.f32.mrb[3].mxu0 }
 0x3f7   : > { %v863_v59 = vsel %vm862_vm7, %v856_v54, 0.0  ;;  %v877_v61 = vrot.slane %v856_v54, 2 }
 0x3f8   : > { %v864_v62 = vrot.slane %v863_v59, 4 }
 0x3f9   : > { %v879_v63 = vsel %vm862_vm7, %v877_v61, 0.0 }
 0x3fa   : > { %v865_v4 = vadd.f32 %v864_v62, %v863_v59  ;;  %v880_v5 = vrot.slane %v879_v63, 4 }
 0x3fc   : > { %v866_v6 = vrot.slane %v865_v4, 2  ;;  %v881_v9 = vadd.f32 %v880_v5, %v879_v63 }
 0x3fe   : > { %v867_v10 = vadd.f32 %v866_v6, %v865_v4  ;;  %v882_v11 = vrot.slane %v881_v9, 2 }
 0x400   : > { %v868_v14 = vrot.slane %v867_v10, 1  ;;  %v883_v15 = vadd.f32 %v882_v11, %v881_v9 }
 0x402   : > { %v869_v12 = vadd.f32 %v868_v14, %v867_v10  ;;  %v884_v13 = vrot.slane %v883_v15, 1 }
 0x404   : > { %v870_v17 = vmul.f32 0.5, %v869_v12  ;;  %v885_v18 = vadd.f32 %v884_v13, %v883_v15 }
 0x406   : > { %v886_v19 = vmul.f32 0.5, %v885_v18  ;;  %v875_v30 = vsel %vm874_vm8, %v870_v17, %v859_v8 }
 0x408   : > { %v891_v31 = vsel %vm890_vm9, %v886_v19, %v875_v30 }
 0x409   : > { %1136 = vmatmul.mubr.msk.f32.vlgmr.msra.gmra.mrb[2].mxu1 %vm543_vm5, %v891_v31 }
 0x4dc   : > { %v965_v39 = vpop.f32.mrb[2].mxu1 }
 0x4dd   : > { %970 = vst [vmem:[%s341_s28] sm:$0xff] %v965_v39  ;;  %v967_v1 = vpop.f32.mrb[3].mxu1 }
 0x4de   : > { %971 = vst [vmem:[%s341_s28 + $0x8] sm:$0xff] %v967_v1 }
 0x4df   : > { %1419 = shalt.err (!%p1416_p4)
}
 0x4e0   : > { %s1420_s21 = scalar_lea.hbm %s1931_s20, 256  ;;  %s1424_s17 = scalar_lea.hbm %s1979_s6, 512 }
 0x4e1   : > { %p1421_p8 = scmp.ne.s32.totalorder %s1931_s20, %s1420_s21  ;;  %p1425_p7 = scmp.lt.u32.totalorder %s1931_s20, %s1979_s6 }
 0x4e2   : > { %p1426_p9 = scmp.lt.u32.totalorder %s1424_s17, %s1420_s21  ;;  %p1428_p3 = scmp.lt.u32.totalorder %s1420_s21, %s1931_s20 }
 0x4e3   : > { %p1422_p0 = pnand %p1421_p8, %p2007_p6 }
 0x4e4   : > { %p1427_p2 = por %p1426_p9, %p1425_p7 }
 0x4e5   : > { %p1423_p1 = pneg %p1422_p0 }
 0x4e6   : > { %p1429_p5 = por %p1428_p3, %p1427_p2 }
 0x4e8   : > { %p1430_p10 = pnand %p1429_p5, %p1423_p1 }
 0x4ea   : > { %1433 = shalt.err (!%p1430_p10)
}
 0x4eb   : > { %1199 = dma.vmem_to_hbm [thread:$0]  (%p2007_p6), %s1926_s14, 256, %s1931_s20, %s973_s24  }
 0x4ec PF: > { %s999_s15 = sand.u32 1, %s1474_s7   ;;  %p2008_p12 = scmp.ne.s32.totalorder %s1993_s19, 0 }
 0x4ed   : > { %p2009_p13 = scmp.ge.s32.totalorder %s1486_s10, 2  ;;  %s1000_s11 = scalar_lea.sflag [#allocation6], %s999_s15 }
 0x4ef   : > { %p1216_p11 = pnand %p2009_p13, %p2008_p12 }
 0x4f1   : > { %1469 = dma.done.wait (!%p1216_p11), %s1000_s11, 256  }
 0x4f2   : > { %1471 = vsyncadd (!%p1216_p11), %s1000_s11, 4294967040  ;;  %s2010_s22 = sld [smem:[#allocation19_spill]]  ;;  %s2011_s9 = sld [smem:[#allocation20_spill]] }
 0x4f3   : > { %p29_p4 = scmp.ge.s32.totalorder %s1575_s12, 4   ;;  %s2012_s7 = smov %s1478_s8 }
 0x4f4   : > { %s2014_s10 = smov %s1575_s12 }
 0x4f5   :  { %31 = sbr.rel (!%p29_p4) target bundleno = 22 (0x16), region = 118 }
 0x4f8   : > { %s2013_s8 = smov %s2010_s22 }
 0x4fc   :  { %1005 = vsyncpa [#allocation5], 1 }
 0x4fd   :  { %1007 = vsyncpa [#allocation5 + $0x1], 1 }
 0x4fe   :  { %1008 = vsyncpa [#allocation8], 1 }
 0x4ff   :  { %1010 = vsyncpa [#allocation8 + $0x1], 1 }
 0x500   :  { %1011 = vsyncpa [#allocation11], 1 }
 0x501   :  { %1013 = vsyncpa [#allocation11 + $0x1], 1 }
 0x502   :  { %1014 = vsyncpa [#allocation6], 1 }
 0x503   :  { %1016 = vsyncpa [#allocation6 + $0x1], 1 }

</bundles_post_ra>
